<compile_context>
chip_gen: v7x
topology: tpu7x:2x2x1
jax: 0.10.0
libtpu: 0.0.40
codegen_flags: <defaults>
</compile_context>

<pallas_src>
import numpy as np
import jax
import jax.numpy as jnp
from jax import lax
from jax.experimental import pallas as pl
from jax.experimental.pallas import tpu as pltpu


# ----------------------------------------------------------------------------
# Pallas kernel: one (TM, TN) tile of the scaled similarity matrix.
# Operands arrive pre-scaled / pre-cast; RHS arrives pre-transposed (D, TN).
# ----------------------------------------------------------------------------
def _sim_kernel(xl_ref, xr_ref, out_ref):
    out_ref[...] = jnp.dot(
        xl_ref[...], xr_ref[...],
        preferred_element_type=jnp.float32).astype(out_ref.dtype)


# ----------------------------------------------------------------------------
# Tile selection: VMEM-budgeted, lane-dense, padding-aware.
# ----------------------------------------------------------------------------
_STEP_OVERHEAD_BYTES = 400_000  # ~0.35 us/grid-step expressed as HBM-equivalent bytes


def _round_up(x, m):
    return ((x + m - 1) // m) * m


def _choose_tiles(n, d, in_bytes, out_bytes, vmem_budget):
    """Pick (tm, tn, n_pad): tiles are multiples of 128 with tn | tm, the
    double-buffered working set fits `vmem_budget`, and a simple HBM-traffic +
    per-step-overhead model (with a >=2-block preference for v7x's two TCs)
    picks among the candidates."""
    n128 = _round_up(max(n, 1), 128)
    tm_cap = min(1024, n128)
    tn_cap = min(512, n128)
    best = None
    for tm in range(128, tm_cap + 1, 128):
        for tn in range(128, min(tn_cap, tm) + 1, 128):
            if tm % tn:
                continue  # keep lcm(tm, tn) == tm so padding stays cheap
            # Double-buffered lhs + rhs + out tiles (BlockSpec pipelining).
            wset = 2 * (tm * d * in_bytes + tn * d * in_bytes + tm * tn * out_bytes)
            if wset > vmem_budget:
                continue
            n_pad = _round_up(n, tm)  # multiple of tm (and of tn since tn | tm)
            gi, gj = n_pad // tm, n_pad // tn
            # Output written once; lhs read once; rhs re-streamed once per outer
            # i block; plus fixed per-grid-step overhead.
            traffic = (n_pad * n_pad * out_bytes
                       + n_pad * d * in_bytes
                       + gi * n_pad * d * in_bytes
                       + gi * gj * _STEP_OVERHEAD_BYTES)
            # v7x megacore only helps if there are >= 2 blocks to shard.
            cost = traffic / min(2, gi * gj)
            if best is None or cost < best[0]:
                best = (cost, tm, tn, n_pad)
    if best is None:
        # D so large that even 128x128 tiles blow the budget.
        # TODO(synk): add a K-tiled ("arbitrary") grid axis with an f32 VMEM
        # accumulator for huge D instead of falling back like this.
        return 128, 128, n128
    _, tm, tn, n_pad = best
    return tm, tn, n_pad


# ----------------------------------------------------------------------------
# Scaled-similarity hot path.
# ----------------------------------------------------------------------------
def simclr_scaled_similarity(xl, xr, *, out_dtype=jnp.bfloat16,
                             vmem_budget=32 << 20):
    """sim[i, j] = xl_i . xr_j  returned as an (N, N) `out_dtype` matrix.

    `xl` / `xr` are the pre-scaled, pre-cast (N, D) operands (the lhs already
    folds 1/temperature).  Runs as a 2-D grid of lane-dense (tm, tn) output
    tiles with BlockSpec double-buffered pipelining; the rhs is passed
    pre-transposed so the MXU sees the canonical (M, K) @ (K, N) contraction.
    """
    N, D = xl.shape
    in_bytes = jnp.dtype(xl.dtype).itemsize
    out_bytes = jnp.dtype(out_dtype).itemsize
    tm, tn, n_pad = _choose_tiles(N, D, in_bytes, out_bytes, vmem_budget)

    if n_pad != N:
        pad = n_pad - N
        xl = jnp.pad(xl, ((0, pad), (0, 0)))
        xr = jnp.pad(xr, ((0, pad), (0, 0)))
    # One-time (N, D) -> (D, N) transpose in XLA: avoids per-tile in-kernel
    # transposes from an A @ B^T contraction (2 XLUs on v6e/v7x).
    xr_t = xr.T

    grid = (n_pad // tm, n_pad // tn)
    sim = pl.pallas_call(
        _sim_kernel,
        out_shape=jax.ShapeDtypeStruct((n_pad, n_pad), out_dtype),
        grid_spec=pltpu.PrefetchScalarGridSpec(
            num_scalar_prefetch=0,
            grid=grid,
            in_specs=[
                pl.BlockSpec((tm, D), lambda i, j: (i, 0)),   # lhs rows (fetched once per i)
                pl.BlockSpec((D, tn), lambda i, j: (0, j)),   # rhs cols (re-streamed per i)
            ],
            out_specs=pl.BlockSpec((tm, tn), lambda i, j: (i, j)),
        ),
        compiler_params=pltpu.CompilerParams(
            dimension_semantics=("parallel", "parallel"),
            # Explicit limit: safe on v5e/v6e (128 MiB physical) and v7x
            # (64 MiB physical); well above the 32 MiB tiling budget.
            vmem_limit_bytes=48 << 20),
        cost_estimate=pl.CostEstimate(
            flops=2 * n_pad * n_pad * D,
            transcendentals=0,
            bytes_accessed=(n_pad * n_pad * out_bytes
                            + n_pad * D * in_bytes
                            + grid[0] * n_pad * D * in_bytes)),
    )(xl, xr_t)

    return sim[:N, :N]


# ----------------------------------------------------------------------------
# SimCLR forward: similarity kernel + single-pass select-based compaction.
# ----------------------------------------------------------------------------
def simclr_forward(features, n_views=2, temperature=0.07,
                   compute_dtype=jnp.bfloat16, sim_dtype=jnp.bfloat16):
    """Replicates SimCLR.forward(features) -> (logits, labels).

    Set compute_dtype=sim_dtype=jnp.float32 for bit-closer parity with torch's
    f32 normalize + matmul (bf16 is ~1e-1 absolute on logits spanning +-1/T).
    """
    N, _ = features.shape
    bs = N // n_views
    assert N == n_views * bs, "rows must be n_views * batch_size"

    x = features.astype(jnp.float32)

    # Hoisted row normalization (torch F.normalize, eps=1e-12); 1/temperature
    # folded into the lhs scale so there is no N x N epilogue multiply.
    ss = jnp.sum(x * x, axis=1, keepdims=True)
    inv_norm = lax.rsqrt(jnp.maximum(ss, 1e-24))        # == 1 / max(||x||, 1e-12)
    # Pre-scale + pre-cast once in XLA (the kernel previously redid this per
    # tile and streamed f32 operands + two (tile, 1) scale vectors from HBM).
    xl = (x * (inv_norm * (1.0 / temperature))).astype(compute_dtype)
    xr = (x * inv_norm).astype(compute_dtype)

    # Hot path on TPU: scaled similarity matrix (already divided by T).
    sim = simclr_scaled_similarity(xl, xr, out_dtype=sim_dtype)   # (N, N)

    rows = jnp.arange(N)
    r = (rows % bs)[:, None]        # residue: same-label column within each bs block
    a = (rows // bs)[:, None]       # which same-label block holds the diagonal

    sim3 = sim.reshape(N, n_views, bs)                  # [i, k, c] = sim[i, k*bs + c]

    # Positives: the residue column of every bs block (tiny per-row gather),
    # then delete the diagonal block with one select.  (n_views-1 columns.)
    same_vals = jnp.take_along_axis(sim3, r[:, :, None], axis=2)[:, :, 0]   # (N, n_views)
    colv = jnp.arange(n_views - 1)[None, :]
    positives = jnp.where(colv < a, same_vals[:, :n_views - 1], same_vals[:, 1:])

    # Negatives: delete the residue column from every bs block in ONE select
    # pass over the N^2 matrix (column order preserved, gather-free).
    colb = jnp.arange(bs - 1)[None, None, :]
    negatives = jnp.where(colb < r[:, None, :],
                          sim3[:, :, :bs - 1],
                          sim3[:, :, 1:]).reshape(N, n_views * (bs - 1))

    # TODO(synk): fusing this per-row boolean-mask compaction into the kernel
    # epilogue would need row-dependent column shifts not expressible via
    # BlockSpec; it stays as (single-pass) select-based XLA glue.
    logits = jnp.concatenate([positives, negatives], axis=1).astype(jnp.float32)
    labels = jnp.zeros((N,), dtype=jnp.int32)           # torch.long -> int32
    return logits, labels


# ----------------------------------------------------------------------------
# Pure-numpy reference mirroring the torch module exactly (for verification).
# ----------------------------------------------------------------------------
def _reference_forward(features, n_views, temperature):
    f = np.asarray(features, dtype=np.float32)
    N = f.shape[0]
    bs = N // n_views
    lab = np.concatenate([np.arange(bs) for _ in range(n_views)], axis=0)
    labm = (lab[None, :] == lab[:, None]).astype(np.float32)
    norm = np.maximum(np.linalg.norm(f, axis=1, keepdims=True), 1e-12)
    fn = f / norm
    sim = fn @ fn.T
    mask = np.eye(N, dtype=bool)
    labm = labm[~mask].reshape(N, -1)
    sim = sim[~mask].reshape(N, -1)
    pos = sim[labm.astype(bool)].reshape(N, -1)
    neg = sim[~labm.astype(bool)].reshape(N, -1)
    logits = np.concatenate([pos, neg], axis=1) / temperature
    labels = np.zeros(N, dtype=np.int32)
    return logits, labels


if __name__ == "__main__":
    n_views = 2
    bs = 8
    D = 32
    N = n_views * bs

    key = jax.random.PRNGKey(0)
    features = jax.random.normal(key, (N, D), dtype=jnp.float32)

    logits, labels = simclr_forward(features, n_views=n_views, temperature=0.07)
    logits = jax.block_until_ready(logits)
    labels = jax.block_until_ready(labels)

    assert logits.shape == (N, N - 1), logits.shape
    assert labels.shape == (N,), labels.shape

    ref_logits, ref_labels = _reference_forward(np.asarray(features), n_views, 0.07)
    max_err = float(np.max(np.abs(np.asarray(logits) - ref_logits)))
    assert np.allclose(np.asarray(logits), ref_logits, rtol=2e-2, atol=2e-1), max_err
    assert np.array_equal(np.asarray(labels), ref_labels)

    print("KERNEL_OK")
</pallas_src>

<mosaic_0001>
module attributes {stable_mosaic.version = 11 : i64} {
  func.func @_sim_kernel(%arg0: i32, %arg1: i32, %arg2: memref<128x32xbf16, #tpu.memory_space<vmem>>, %arg3: memref<32x128xbf16, #tpu.memory_space<vmem>>, %arg4: memref<128x128xbf16, #tpu.memory_space<vmem>>) attributes {dimension_semantics = [#tpu.dimension_semantics<parallel>, #tpu.dimension_semantics<parallel>], iteration_bounds = array<i64: 1, 1>, scalar_prefetch = 0 : i64, scratch_operands = 0 : i64, tpu.core_type = #tpu.core_type<tc>, window_params = [{transform_indices = @transform_0, window_bounds = array<i64: 128, 32>}, {transform_indices = @transform_1, window_bounds = array<i64: 32, 128>}, {transform_indices = @transform_2, window_bounds = array<i64: 128, 128>}]} {
    %c0 = arith.constant 0 : index
    %c0_0 = arith.constant 0 : index
    %0 = vector.load %arg2[%c0, %c0_0] : memref<128x32xbf16, #tpu.memory_space<vmem>>, vector<128x32xbf16>
    %c0_1 = arith.constant 0 : index
    %c0_2 = arith.constant 0 : index
    %1 = vector.load %arg3[%c0_1, %c0_2] : memref<32x128xbf16, #tpu.memory_space<vmem>>, vector<32x128xbf16>
    %cst = arith.constant dense<0.000000e+00> : vector<128x128xf32>
    %2 = tpu.matmul %0, %1, %cst {dimension_numbers = #tpu.dot_dimension_numbers<[1], [0], [0], [1], [0, 0, 1, 1], [], []>} : vector<128x32xbf16>, vector<32x128xbf16>, vector<128x128xf32> -> vector<128x128xf32>
    %3 = arith.truncf %2 : vector<128x128xf32> to vector<128x128xbf16>
    %c0_3 = arith.constant 0 : index
    %c0_4 = arith.constant 0 : index
    %4 = vector.load %arg4[%c0_3, %c0_4] : memref<128x128xbf16, #tpu.memory_space<vmem>>, vector<128x128xbf16>
    tpu.vector_store %arg4[%c0_3, %c0_4], %3 {strides = array<i32>} : memref<128x128xbf16, #tpu.memory_space<vmem>>, vector<128x128xbf16>,
    return
  }
  func.func @transform_0(%arg0: i32, %arg1: i32) -> (i32, i32) {
    %c0_i32 = arith.constant 0 : i32
    %c0_i32_0 = arith.constant 0 : i32
    return %arg0, %c0_i32 : i32, i32
  }
  func.func @transform_1(%arg0: i32, %arg1: i32) -> (i32, i32) {
    %c0_i32 = arith.constant 0 : i32
    %c0_i32_0 = arith.constant 0 : i32
    return %c0_i32, %arg1 : i32, i32
  }
  func.func @transform_2(%arg0: i32, %arg1: i32) -> (i32, i32) {
    %c0_i32 = arith.constant 0 : i32
    return %arg0, %arg1 : i32, i32
  }
}

</mosaic_0001>

<bundles_post_ra>
// kernel: tpu_custom_call.1
= control target key start
LH: loop header
LB: loop body
LE: loop exit
PB: predicated region body
PF: predicated region fallthrough
CT: control target
= control target key end

     0   :  { %vm85_vm0 = vcmask 261120   ;;  %s539_s0 = inlined_call_operand.vmem [shape: bf16[128,32], index: 0, kind: input, shape index: {}]   ;;  %s540_s1 = inlined_call_operand.vmem [shape: bf16[32,128], index: 1, kind: input, shape index: {}]   ;;  %s541_s2 = inlined_call_operand.hbm [shape: bf16[128,128], index: 2, kind: output, shape index: {}]  }
   0x1   :  { %v437_v0 = vld [vmem:[%s540_s1] sm:$0xff]   ;;  %v438_v1 = vld [vmem:[%s540_s1 + $0x8] sm:$0xff]   ;;  %v443_v6 = vld [vmem:[%s539_s0 + $0x10] sm:$0xff]  }
   0x2   :  { %410 = vmatprep.subr.bf16.mxu0 %v437_v0  ;;  %430 = vmatprep.subr.bf16.mxu1 %v437_v0  ;;  %v439_v2 = vld [vmem:[%s539_s0] sm:$0xff]   ;;  %v441_v4 = vld [vmem:[%s539_s0 + $0x8] sm:$0xff]   ;;  %v444_v7 = vld [vmem:[%s539_s0 + $0x30] sm:$0xff]  }
   0x3   :  { %411 = vmatpush3.bf16.msra.mxu0 %v437_v0  ;;  %432 = vmatpush3.bf16.msra.mxu1 %v437_v0  ;;  %v440_v3 = vld [vmem:[%s539_s0 + $0x20] sm:$0xff]   ;;  %v442_v5 = vld [vmem:[%s539_s0 + $0x28] sm:$0xff]  }
   0x4   :  { %412 = vmatprep.subr.bf16.mxu0 %v438_v1  ;;  %431 = vmatprep.subr.bf16.mxu1 %v438_v1 }
   0x5   :  { %414 = vmatprep.mubr.msk.bf16.mxu0 %vm85_vm0, %v439_v2  ;;  %422 = vmatprep.mubr.msk.bf16.mxu1 %vm85_vm0, %v440_v3 }
   0x7   :  { %413 = vmatpush3.bf16.msra.mxu0 %v438_v1  ;;  %433 = vmatpush3.bf16.msra.mxu1 %v438_v1 }
   0xa   :  { %415 = vmatmul.mubr.msk.bf16.vlgmr.msra.gmra.mrb[0].mxu0 %vm85_vm0, %v441_v4  ;;  %423 = vmatmul.mubr.msk.bf16.vlgmr.msra.gmra.mrb[0].mxu1 %vm85_vm0, %v442_v5 }
   0xb   :  { %7 = vsyncpa [#allocation3], 0  ;;  %418 = vmatprep.mubr.msk.bf16.mxu0 %vm85_vm0, %v443_v6  ;;  %426 = vmatprep.mubr.msk.bf16.mxu1 %vm85_vm0, %v444_v7  ;;  %v445_v8 = vld [vmem:[%s539_s0 + $0x18] sm:$0xff]  }
   0xc   :  { %v446_v9 = vld [vmem:[%s539_s0 + $0x38] sm:$0xff]   ;;  %s471_s0 = smov [#allocation2]  }
   0xd   :  { %s292_s28 = sshll.u32 %s471_s0, 4  ;;  %s293_s28 = int_to_ptr.vmem [resolvable:$true] %s292_s28 }
   0xe   :  { %s447_s29 = scalar_lea.vmem %s293_s28, 1024  ;;  %p452_p1 = scmp.lt.s32.totalorder %s293_s28, %s293_s28 }
   0xf   :  { %p448_p0 = scmp.ne.s32.totalorder %s293_s28, %s447_s29  ;;  %p453_p2 = scmp.lt.s32.totalorder %s447_s29, %s447_s29 }
  0x11   :  { %p454_p3 = por %p453_p2, %p452_p1 }
  0x12   :  { %419 = vmatmul.mubr.msk.bf16.gmra.mrb[4].mxu0 %vm85_vm0, %v445_v8  ;;  %427 = vmatmul.mubr.msk.bf16.gmra.mrb[4].mxu1 %vm85_vm0, %v446_v9 }
  0x13   :  { %p455_p4 = pnand %p454_p3, %p448_p0 }
  0xdd   :  { %v416_v10 = vpop.f32.mrb[0].mxu0  ;;  %v424_v11 = vpop.f32.mrb[0].mxu1 }
  0xde   :  { %v144_v12 = vpop.f32.mrb[1].mxu0  ;;  %v176_v13 = vpop.f32.mrb[1].mxu1 }
  0xdf   :  { %v417_v14 = vpop.f32.mrb[2].mxu0  ;;  %v425_v15 = vpop.f32.mrb[2].mxu1 }
  0xe0   :  { %v361_v16 = vpack.c.bf16 %v417_v14, %v416_v10  ;;  %v381_v17 = vpack.c.bf16 %v425_v15, %v424_v11  ;;  %v147_v18 = vpop.f32.mrb[3].mxu0  ;;  %v179_v19 = vpop.f32.mrb[3].mxu1 }
  0xe1   :  { %v356_v20 = vpack.c.bf16 %v147_v18, %v144_v12  ;;  %v376_v21 = vpack.c.bf16 %v179_v19, %v176_v13 }
  0xe2   :  { %393 = vst [vmem:[#allocation2 + $0x8] sm:$0xff] %v361_v16   ;;  %397 = vst [vmem:[#allocation2 + $0x28] sm:$0xff] %v381_v17  }
  0xe3   :  { %357 = vst [vmem:[#allocation2] sm:$0xff] %v356_v20   ;;  %396 = vst [vmem:[#allocation2 + $0x20] sm:$0xff] %v376_v21  }
  0xe5   :  { %v420_v22 = vpop.f32.mrb[4].mxu0  ;;  %v428_v23 = vpop.f32.mrb[4].mxu1 }
  0xe6   :  { %v160_v24 = vpop.f32.mrb[5].mxu0  ;;  %v192_v25 = vpop.f32.mrb[5].mxu1 }
  0xe7   :  { %v421_v26 = vpop.f32.mrb[6].mxu0  ;;  %v429_v27 = vpop.f32.mrb[6].mxu1 }
  0xe8   :  { %v371_v28 = vpack.c.bf16 %v421_v26, %v420_v22  ;;  %v391_v29 = vpack.c.bf16 %v429_v27, %v428_v23  ;;  %v163_v30 = vpop.f32.mrb[7].mxu0  ;;  %v195_v31 = vpop.f32.mrb[7].mxu1 }
  0xe9   :  { %v366_v32 = vpack.c.bf16 %v163_v30, %v160_v24  ;;  %v386_v33 = vpack.c.bf16 %v195_v31, %v192_v25 }
  0xea   :  { %395 = vst [vmem:[#allocation2 + $0x18] sm:$0xff] %v371_v28   ;;  %399 = vst [vmem:[#allocation2 + $0x38] sm:$0xff] %v391_v29  }
  0xeb   :  { %394 = vst [vmem:[#allocation2 + $0x10] sm:$0xff] %v366_v32   ;;  %398 = vst [vmem:[#allocation2 + $0x30] sm:$0xff] %v386_v33  }
  0xec   :  { %458 = shalt.err (!%p455_p4)
}
  0xed   :  { %s459_s4 = scalar_lea.hbm %s541_s2, 1024 }
  0xee   :  { %p460_p5 = scmp.ne.s32.totalorder %s541_s2, %s459_s4  ;;  %p463_p6 = scmp.lt.u32.totalorder %s459_s4, %s541_s2 }
  0xf0   :  { %p465_p7 = pnand %p463_p6, %p460_p5 }
  0xf2   :  { %468 = shalt.err (!%p465_p7)
}
  0xf3   :  { %s472_s9 = smov 64   ;;  %s473_s10 = smov 4  }
  0xf4   :  { %298 = dma.vmem_to_hbm [thread:$0]  %s293_s28, 1024, %s541_s2, [#allocation3], %s472_s9, %s472_s9, %s473_s10  }
  0xf5   :  { %469 = dma.done.wait [#allocation3], 1024  }
  0xf6   :  { %470 = vsyncadd [#allocation3], 4294966272 }
  0xf7   :  { %302 = vsyncpa [#allocation3], 1 }

</bundles_post_ra>
